<compile_context>
chip_gen: v5e
topology: v5e:2x2
jax: 0.10.0
libtpu: 0.0.40
codegen_flags: <defaults>
</compile_context>

<pallas_src>
import jax
import jax.numpy as jnp
from jax.experimental import pallas as pl
from jax.experimental.pallas import tpu as pltpu

TK = 512        # K (in_channels) tile for the fc1 reduction
TM_DEFAULT = 128  # row tile (safe on v5e; also fine on v6e/v7x)
CLS_PAD = 128   # lane-dense width for the 1-logit classifier output


def _round_up(x, m):
    return (x + m - 1) // m * m


def dains_head_kernel(x_ref, w1_ref, b1_ref, w2_ref, b2_ref, w3_ref, b3_ref,
                      out_ref, acc_ref):
    """Fused fc1(+relu) / fc2(+relu) / cls with K-tiled fc1 accumulation."""
    k = pl.program_id(1)

    @pl.when(k == 0)
    def _():
        acc_ref[...] = jnp.zeros_like(acc_ref)

    # fc1 partial product for this K slab (bf16 MXU, f32 accumulation).
    acc_ref[...] += jnp.dot(x_ref[...].astype(jnp.bfloat16), w1_ref[...],
                            preferred_element_type=jnp.float32)

    @pl.when(k == pl.num_programs(1) - 1)
    def _():
        h1 = jnp.maximum(acc_ref[...] + b1_ref[...], 0.0)
        h2 = jnp.dot(h1.astype(jnp.bfloat16), w2_ref[...],
                     preferred_element_type=jnp.float32)
        h2 = jnp.maximum(h2 + b2_ref[...], 0.0)
        out_ref[...] = (jnp.dot(h2.astype(jnp.bfloat16), w3_ref[...],
                                preferred_element_type=jnp.float32)
                        + b3_ref[...]).astype(out_ref.dtype)


def prepare_dains_params(params, weight_dtype=jnp.bfloat16):
    """One-time parameter prep (NOT per forward call):
    transpose to (in, out), zero-pad to TPU tile multiples, cast weights to bf16."""
    feat, in_ch = params["w1"].shape
    featp = _round_up(feat, 128)
    tk = min(TK, _round_up(in_ch, 128))
    kp = _round_up(in_ch, tk)

    def pad2(a, rows, cols):
        return jnp.pad(a, ((0, rows - a.shape[0]), (0, cols - a.shape[1])))

    return {
        "w1t": pad2(params["w1"].T, kp, featp).astype(weight_dtype),
        "b1": jnp.pad(params["b1"], (0, featp - feat)).reshape(1, featp).astype(jnp.float32),
        "w2t": pad2(params["w2"].T, featp, featp).astype(weight_dtype),
        "b2": jnp.pad(params["b2"], (0, featp - feat)).reshape(1, featp).astype(jnp.float32),
        "w3t": pad2(params["w3"].T, featp, CLS_PAD).astype(weight_dtype),
        "b3": jnp.pad(params["b3"], (0, CLS_PAD - 1)).reshape(1, CLS_PAD).astype(jnp.float32),
    }


def dains_head_forward(x, prepared, tm=TM_DEFAULT):
    """x: (N, C, H, W) float32, prepared: output of prepare_dains_params.
    Returns (N, 1) float32 domain logits."""
    n = x.shape[0]
    x2d = x.reshape(n, -1).astype(jnp.float32)       # GRL is identity in forward
    in_ch = x2d.shape[1]

    kp, featp = prepared["w1t"].shape
    tk = min(TK, kp)
    tm = min(tm, _round_up(n, 8))
    n_pad = _round_up(n, tm)

    if (n_pad != n) or (kp != in_ch):
        x2d = jnp.pad(x2d, ((0, n_pad - n), (0, kp - in_ch)))

    grid = (n_pad // tm, kp // tk)                   # reduction axis last

    flops = 2 * n_pad * (kp * featp + featp * featp + featp * CLS_PAD)
    bytes_accessed = (x2d.size * 4
                      + 2 * (prepared["w1t"].size + prepared["w2t"].size
                             + prepared["w3t"].size)
                      + 4 * (prepared["b1"].size + prepared["b2"].size
                             + prepared["b3"].size)
                      + n_pad * CLS_PAD * 4)

    out_padded = pl.pallas_call(
        dains_head_kernel,
        out_shape=jax.ShapeDtypeStruct((n_pad, CLS_PAD), jnp.float32),
        grid_spec=pltpu.PrefetchScalarGridSpec(
            num_scalar_prefetch=0,
            grid=grid,
            in_specs=[
                pl.BlockSpec((tm, tk), lambda i, k: (i, k)),         # x tile
                pl.BlockSpec((tk, featp), lambda i, k: (k, 0)),      # w1^T K slab
                pl.BlockSpec((1, featp), lambda i, k: (0, 0)),       # b1 (resident)
                pl.BlockSpec((featp, featp), lambda i, k: (0, 0)),   # w2^T (resident)
                pl.BlockSpec((1, featp), lambda i, k: (0, 0)),       # b2 (resident)
                pl.BlockSpec((featp, CLS_PAD), lambda i, k: (0, 0)), # w3^T padded
                pl.BlockSpec((1, CLS_PAD), lambda i, k: (0, 0)),     # b3 padded
            ],
            out_specs=pl.BlockSpec((tm, CLS_PAD), lambda i, k: (i, 0)),
            scratch_shapes=[pltpu.VMEM((tm, featp), jnp.float32)],   # fc1 accumulator
        ),
        compiler_params=pltpu.CompilerParams(
            dimension_semantics=("parallel", "arbitrary"),
            vmem_limit_bytes=32 * 1024 * 1024,
        ),
        cost_estimate=pl.CostEstimate(flops=flops, transcendentals=0,
                                      bytes_accessed=bytes_accessed),
    )(x2d, prepared["w1t"], prepared["b1"], prepared["w2t"], prepared["b2"],
      prepared["w3t"], prepared["b3"])

    return out_padded[:n, :1]


def init_dains_params(key, in_channels, feat_channels):
    """Mirrors DAInsHead.init_weights(): N(0, 0.01) for fc1/fc2, N(0, 0.05) for
    da_cls, zero biases.  PyTorch weight layout (out, in)."""
    k1, k2, k3 = jax.random.split(key, 3)
    return {
        "w1": 0.01 * jax.random.normal(k1, (feat_channels, in_channels), jnp.float32),
        "b1": jnp.zeros((feat_channels,), jnp.float32),
        "w2": 0.01 * jax.random.normal(k2, (feat_channels, feat_channels), jnp.float32),
        "b2": jnp.zeros((feat_channels,), jnp.float32),
        "w3": 0.05 * jax.random.normal(k3, (1, feat_channels), jnp.float32),
        "b3": jnp.zeros((1,), jnp.float32),
    }


def dains_head_ref_bf16(x, params):
    """Pure-JAX reference matching the kernel's precision recipe
    (bf16 operands, f32 accumulation)."""
    x2d = x.reshape(x.shape[0], -1)
    h1 = jnp.maximum(
        jnp.dot(x2d.astype(jnp.bfloat16), params["w1"].T.astype(jnp.bfloat16),
                preferred_element_type=jnp.float32) + params["b1"], 0.0)
    h2 = jnp.maximum(
        jnp.dot(h1.astype(jnp.bfloat16), params["w2"].T.astype(jnp.bfloat16),
                preferred_element_type=jnp.float32) + params["b2"], 0.0)
    return jnp.dot(h2.astype(jnp.bfloat16), params["w3"].T.astype(jnp.bfloat16),
                   preferred_element_type=jnp.float32) + params["b3"]


def dains_head_ref_f32(x, params):
    """Full-f32 reference (same math as the PyTorch forward)."""
    x2d = x.reshape(x.shape[0], -1)
    h1 = jnp.maximum(x2d @ params["w1"].T + params["b1"], 0.0)
    h2 = jnp.maximum(h1 @ params["w2"].T + params["b2"], 0.0)
    return h2 @ params["w3"].T + params["b3"]


if __name__ == "__main__":
    # Small shapes: batch of 8 ROI feature maps, 4 channels, 16x16 spatial
    # -> in_channels = 4*16*16 = 1024, feat_channels = 256 (scaled-down module).
    # With TK=512 this still exercises the K-tiled fc1 accumulation (2 K steps).
    N, C, H, W = 8, 4, 16, 16
    FEAT = 256

    key = jax.random.PRNGKey(0)
    kx, kp = jax.random.split(key)
    x = jax.random.normal(kx, (N, C, H, W), jnp.float32)
    params = init_dains_params(kp, C * H * W, FEAT)
    prepared = prepare_dains_params(params)   # one-time transpose/pad/bf16 cast

    fwd = jax.jit(dains_head_forward, static_argnames=("tm",))
    out = fwd(x, prepared, tm=128)
    out = jax.block_until_ready(out)

    assert out.shape == (N, 1), out.shape
    ref_bf16 = dains_head_ref_bf16(x, params)
    ref_f32 = dains_head_ref_f32(x, params)
    assert jnp.allclose(out, ref_bf16, atol=2e-3, rtol=1e-2), (
        float(jnp.max(jnp.abs(out - ref_bf16))))
    assert jnp.allclose(out, ref_f32, atol=1e-2, rtol=5e-2), (
        float(jnp.max(jnp.abs(out - ref_f32))))

    print("KERNEL_OK")
</pallas_src>

<mosaic_0001>
module attributes {stable_mosaic.version = 11 : i64} {
  func.func @dains_head_kernel(%arg0: i32, %arg1: i32, %arg2: memref<8x512xf32, #tpu.memory_space<vmem>>, %arg3: memref<512x256xbf16, #tpu.memory_space<vmem>>, %arg4: memref<1x256xf32, #tpu.memory_space<vmem>>, %arg5: memref<256x256xbf16, #tpu.memory_space<vmem>>, %arg6: memref<1x256xf32, #tpu.memory_space<vmem>>, %arg7: memref<256x128xbf16, #tpu.memory_space<vmem>>, %arg8: memref<1x128xf32, #tpu.memory_space<vmem>>, %arg9: memref<8x128xf32, #tpu.memory_space<vmem>>, %arg10: memref<8x256xf32, #tpu.memory_space<vmem>>) attributes {dimension_semantics = [#tpu.dimension_semantics<parallel>, #tpu.dimension_semantics<arbitrary>], iteration_bounds = array<i64: 1, 2>, scalar_prefetch = 0 : i64, scratch_operands = 1 : i64, tpu.core_type = #tpu.core_type<tc>, window_params = [{transform_indices = @transform_0, window_bounds = array<i64: 8, 512>}, {transform_indices = @transform_1, window_bounds = array<i64: 512, 256>}, {pipeline_mode = #tpu.pipeline_mode<synchronous>, transform_indices = @transform_2, window_bounds = array<i64: 1, 256>}, {pipeline_mode = #tpu.pipeline_mode<synchronous>, transform_indices = @transform_3, window_bounds = array<i64: 256, 256>}, {pipeline_mode = #tpu.pipeline_mode<synchronous>, transform_indices = @transform_4, window_bounds = array<i64: 1, 256>}, {pipeline_mode = #tpu.pipeline_mode<synchronous>, transform_indices = @transform_5, window_bounds = array<i64: 256, 128>}, {pipeline_mode = #tpu.pipeline_mode<synchronous>, transform_indices = @transform_6, window_bounds = array<i64: 1, 128>}, {transform_indices = @transform_7, window_bounds = array<i64: 8, 128>}]} {
    %c0_i32 = arith.constant 0 : i32
    %0 = arith.cmpi eq, %arg1, %c0_i32 : i32
    %1 = arith.extui %0 : i1 to i32
    %c0_i32_0 = arith.constant 0 : i32
    %2 = arith.cmpi ne, %1, %c0_i32_0 : i32
    scf.if %2 {
      %cst_9 = arith.constant 0.000000e+00 : f32
      %13 = vector.broadcast %cst_9 : f32 to vector<8x256xf32>
      %c0_10 = arith.constant 0 : index
      %c0_11 = arith.constant 0 : index
      %14 = vector.load %arg10[%c0_10, %c0_11] : memref<8x256xf32, #tpu.memory_space<vmem>>, vector<8x256xf32>
      tpu.vector_store %arg10[%c0_10, %c0_11], %13 {strides = array<i32>} : memref<8x256xf32, #tpu.memory_space<vmem>>, vector<8x256xf32>,
    } else {
    }
    %c0 = arith.constant 0 : index
    %c0_1 = arith.constant 0 : index
    %3 = vector.load %arg10[%c0, %c0_1] : memref<8x256xf32, #tpu.memory_space<vmem>>, vector<8x256xf32>
    %c0_2 = arith.constant 0 : index
    %c0_3 = arith.constant 0 : index
    %4 = vector.load %arg2[%c0_2, %c0_3] : memref<8x512xf32, #tpu.memory_space<vmem>>, vector<8x512xf32>
    %5 = arith.truncf %4 : vector<8x512xf32> to vector<8x512xbf16>
    %c0_4 = arith.constant 0 : index
    %c0_5 = arith.constant 0 : index
    %6 = vector.load %arg3[%c0_4, %c0_5] : memref<512x256xbf16, #tpu.memory_space<vmem>>, vector<512x256xbf16>
    %cst = arith.constant dense<0.000000e+00> : vector<8x256xf32>
    %7 = tpu.matmul %5, %6, %cst {dimension_numbers = #tpu.dot_dimension_numbers<[1], [0], [0], [1], [0, 0, 1, 1], [], []>} : vector<8x512xbf16>, vector<512x256xbf16>, vector<8x256xf32> -> vector<8x256xf32>
    %8 = arith.addf %3, %7 : vector<8x256xf32>
    %c0_6 = arith.constant 0 : index
    %c0_7 = arith.constant 0 : index
    %9 = vector.load %arg10[%c0_6, %c0_7] : memref<8x256xf32, #tpu.memory_space<vmem>>, vector<8x256xf32>
    tpu.vector_store %arg10[%c0_6, %c0_7], %8 {strides = array<i32>} : memref<8x256xf32, #tpu.memory_space<vmem>>, vector<8x256xf32>,
    %c1_i32 = arith.constant 1 : i32
    %10 = arith.cmpi eq, %arg1, %c1_i32 : i32
    %11 = arith.extui %10 : i1 to i32
    %c0_i32_8 = arith.constant 0 : i32
    %12 = arith.cmpi ne, %11, %c0_i32_8 : i32
    scf.if %12 {
      %c0_9 = arith.constant 0 : index
      %c0_10 = arith.constant 0 : index
      %13 = vector.load %arg10[%c0_9, %c0_10] : memref<8x256xf32, #tpu.memory_space<vmem>>, vector<8x256xf32>
      %c0_11 = arith.constant 0 : index
      %c0_12 = arith.constant 0 : index
      %14 = vector.load %arg4[%c0_11, %c0_12] : memref<1x256xf32, #tpu.memory_space<vmem>>, vector<1x256xf32>
      %15 = vector.broadcast %14 : vector<1x256xf32> to vector<8x256xf32>
      %16 = arith.addf %13, %15 : vector<8x256xf32>
      %cst_13 = arith.constant 0.000000e+00 : f32
      %17 = vector.broadcast %cst_13 : f32 to vector<8x256xf32>
      %18 = arith.maximumf %16, %17 : vector<8x256xf32>
      %19 = arith.truncf %18 : vector<8x256xf32> to vector<8x256xbf16>
      %c0_14 = arith.constant 0 : index
      %c0_15 = arith.constant 0 : index
      %20 = vector.load %arg5[%c0_14, %c0_15] : memref<256x256xbf16, #tpu.memory_space<vmem>>, vector<256x256xbf16>
      %cst_16 = arith.constant dense<0.000000e+00> : vector<8x256xf32>
      %21 = tpu.matmul %19, %20, %cst_16 {dimension_numbers = #tpu.dot_dimension_numbers<[1], [0], [0], [1], [0, 0, 1, 1], [], []>} : vector<8x256xbf16>, vector<256x256xbf16>, vector<8x256xf32> -> vector<8x256xf32>
      %c0_17 = arith.constant 0 : index
      %c0_18 = arith.constant 0 : index
      %22 = vector.load %arg6[%c0_17, %c0_18] : memref<1x256xf32, #tpu.memory_space<vmem>>, vector<1x256xf32>
      %23 = vector.broadcast %22 : vector<1x256xf32> to vector<8x256xf32>
      %24 = arith.addf %21, %23 : vector<8x256xf32>
      %cst_19 = arith.constant 0.000000e+00 : f32
      %25 = vector.broadcast %cst_19 : f32 to vector<8x256xf32>
      %26 = arith.maximumf %24, %25 : vector<8x256xf32>
      %27 = arith.truncf %26 : vector<8x256xf32> to vector<8x256xbf16>
      %c0_20 = arith.constant 0 : index
      %c0_21 = arith.constant 0 : index
      %28 = vector.load %arg7[%c0_20, %c0_21] : memref<256x128xbf16, #tpu.memory_space<vmem>>, vector<256x128xbf16>
      %cst_22 = arith.constant dense<0.000000e+00> : vector<8x128xf32>
      %29 = tpu.matmul %27, %28, %cst_22 {dimension_numbers = #tpu.dot_dimension_numbers<[1], [0], [0], [1], [0, 0, 1, 1], [], []>} : vector<8x256xbf16>, vector<256x128xbf16>, vector<8x128xf32> -> vector<8x128xf32>
      %c0_23 = arith.constant 0 : index
      %c0_24 = arith.constant 0 : index
      %30 = vector.load %arg8[%c0_23, %c0_24] : memref<1x128xf32, #tpu.memory_space<vmem>>, vector<1x128xf32>
      %31 = vector.broadcast %30 : vector<1x128xf32> to vector<8x128xf32>
      %32 = arith.addf %29, %31 : vector<8x128xf32>
      %c0_25 = arith.constant 0 : index
      %c0_26 = arith.constant 0 : index
      %33 = vector.load %arg9[%c0_25, %c0_26] : memref<8x128xf32, #tpu.memory_space<vmem>>, vector<8x128xf32>
      tpu.vector_store %arg9[%c0_25, %c0_26], %32 {strides = array<i32>} : memref<8x128xf32, #tpu.memory_space<vmem>>, vector<8x128xf32>,
    } else {
    }
    return
  }
  func.func @transform_0(%arg0: i32, %arg1: i32) -> (i32, i32) {
    %c0_i32 = arith.constant 0 : i32
    return %arg0, %arg1 : i32, i32
  }
  func.func @transform_1(%arg0: i32, %arg1: i32) -> (i32, i32) {
    %c0_i32 = arith.constant 0 : i32
    %c0_i32_0 = arith.constant 0 : i32
    return %arg1, %c0_i32 : i32, i32
  }
  func.func @transform_2(%arg0: i32, %arg1: i32) -> (i32, i32) {
    %c0_i32 = arith.constant 0 : i32
    %c0_i32_0 = arith.constant 0 : i32
    %c0_i32_1 = arith.constant 0 : i32
    return %c0_i32, %c0_i32_0 : i32, i32
  }
  func.func @transform_3(%arg0: i32, %arg1: i32) -> (i32, i32) {
    %c0_i32 = arith.constant 0 : i32
    %c0_i32_0 = arith.constant 0 : i32
    %c0_i32_1 = arith.constant 0 : i32
    return %c0_i32, %c0_i32_0 : i32, i32
  }
  func.func @transform_4(%arg0: i32, %arg1: i32) -> (i32, i32) {
    %c0_i32 = arith.constant 0 : i32
    %c0_i32_0 = arith.constant 0 : i32
    %c0_i32_1 = arith.constant 0 : i32
    return %c0_i32, %c0_i32_0 : i32, i32
  }
  func.func @transform_5(%arg0: i32, %arg1: i32) -> (i32, i32) {
    %c0_i32 = arith.constant 0 : i32
    %c0_i32_0 = arith.constant 0 : i32
    %c0_i32_1 = arith.constant 0 : i32
    return %c0_i32, %c0_i32_0 : i32, i32
  }
  func.func @transform_6(%arg0: i32, %arg1: i32) -> (i32, i32) {
    %c0_i32 = arith.constant 0 : i32
    %c0_i32_0 = arith.constant 0 : i32
    %c0_i32_1 = arith.constant 0 : i32
    return %c0_i32, %c0_i32_0 : i32, i32
  }
  func.func @transform_7(%arg0: i32, %arg1: i32) -> (i32, i32) {
    %c0_i32 = arith.constant 0 : i32
    %c0_i32_0 = arith.constant 0 : i32
    return %arg0, %c0_i32 : i32, i32
  }
}

</mosaic_0001>

<bundles_post_ra>
// kernel: dains_head_forward.1
= control target key start
LH: loop header
LB: loop body
LE: loop exit
PB: predicated region body
PF: predicated region fallthrough
CT: control target
= control target key end

     0   :  { %12 = vsyncpa [#allocation4], 0  ;;  %s2631_s0 = inlined_call_operand.vmem [shape: f32[8,1024], index: 0, kind: input, shape index: {}]   ;;  %s2632_s1 = inlined_call_operand.hbm [shape: bf16[1024,256], index: 1, kind: input, shape index: {}]   ;;  %s2633_s2 = inlined_call_operand.vmem [shape: f32[1,256], index: 2, kind: input, shape index: {}]   ;;  %s2634_s3 = inlined_call_operand.vmem [shape: bf16[256,256], index: 3, kind: input, shape index: {}]   ;;  %s2635_s4 = inlined_call_operand.vmem [shape: f32[1,256], index: 4, kind: input, shape index: {}]   ;;  %s2636_s5 = inlined_call_operand.vmem [shape: bf16[256,128], index: 5, kind: input, shape index: {}]   ;;  %s2637_s6 = inlined_call_operand.vmem [shape: f32[1,128], index: 6, kind: input, shape index: {}]   ;;  %s2638_s7 = inlined_call_operand.vmem [shape: f32[8,128], index: 7, kind: output, shape index: {}]  }
   0x1   :  { %14 = vsyncpa [#allocation4 + $0x1], 0  ;;  %s2138_s24 = smov 0   ;;  %s2140_s25 = smov 0  }
   0x2   :  { %s2142_s26 = smov 0   ;;  %s2144_s27 = smov 0  }
   0x3   :  { %s2146_s28 = smov 0   ;;  %s2148_s29 = smov 0  }
   0x4 LB: > { %s1376_s30 = sadd.s32 4294967295, %s2093_s29   ;;  %s29_s8 = sadd.s32 1, %s2089_s28  ;;  %s2093_s29 = sphi %s2148_s29, %s20_s29   ;;  %s2089_s28 = sphi %s2146_s28, %s2645_s28   ;;  %s2085_s27 = sphi %s2144_s27, %s2644_s27   ;;  %s2081_s26 = sphi %s2142_s26, %s2643_s26   ;;  %s2077_s25 = sphi %s2140_s25, %s2642_s25   ;;  %s2073_s24 = sphi %s2138_s24, %s2641_s24  }
   0x5   : > { %p30_p0 = scmp.ge.s32.totalorder %s29_s8, 2  ;;  %s67_s9 = sadd.s32 1, %s2081_s26 }
   0x6   : > { %p74_p1 = scmp.ne.s32.totalorder %s2081_s26, %s2077_s25  ;;  %p75_p2 = scmp.eq.s32.totalorder %s2093_s29, 0 }
   0x7   : > { %s2647_s8 = smov (%p30_p0, %s29_s8), 0  ;;  %p80_p4 = scmp.ne.s32.totalorder %s2077_s25, %s2073_s24 }
   0x8   : > { %p2174_p3 = por %p75_p2, %p74_p1  ;;  %s64_s11 = ssub.s32 %s2089_s28, %s2647_s8 }
   0x9   : > { %p81_p5 = scmp.eq.s32.totalorder %s1376_s30, 0  ;;  %p65_p6 = scmp.eq.s32.totalorder %s64_s11, 0 }
   0xa   : > { %p1960_p8 = scmp.lt.s32.totalorder %s2093_s29, 2  ;;  %s263_s14 = sand.u32 1, %s2081_s26  }
   0xb   : > { %p2181_p7 = por %p81_p5, %p80_p4  ;;  %s1841_s15 = sshll.u32 %s2089_s28, 9 }
   0xc   : > { %s2187_s13 = scalar_select %p65_p6, %s2081_s26, %s67_s9  }
   0xd   : > { %s1379_s16 = sshll.u32 %s263_s14, 9  ;;  %s273_s19 = scalar_lea.hbm %s2632_s1, %s1841_s15 }
   0xe   : > { %s274_s20 = sshll.u32 %s273_s19, 4  ;;  %s267_s21 = scalar_lea.vmem [#allocation3], %s1379_s16  ;;  %s275_s20 = int_to_ptr.hbm [resolvable:$true] %s274_s20 }
   0xf   : > { %s276_s22 = sshll.u32 %s267_s21, 4  ;;  %p1957_p9 = pnand %p1960_p8, %p2174_p3  ;;  %s277_s22 = int_to_ptr.vmem [resolvable:$true] %s276_s22 }
  0x10   : > { %p1383_p10 = scmp.ge.s32.totalorder %s2093_s29, 1  ;;  %p284_p11 = scmp.lt.s32.totalorder %s2093_s29, 3 }
  0x11   : > { %s264_s23 = scalar_lea.sflag [#allocation4], %s263_s14  ;;  %s2095_s24 = smov 128  }
  0x12   : > { %s2096_s30 = smov 8   ;;  %p285_p12 = pnand %p1383_p10, %p284_p11 }
  0x13   : > { %1959 = dma.hbm_to_vmem [thread:$0]  (!%p1957_p9), %s275_s20, 8192, %s277_s22, %s264_s23, %s2095_s24, %s2095_s24, %s2096_s30  }
  0x14   : > { %288 = sbr.rel (%p285_p12) target bundleno = 555 (0x22b), region = 48  ;;  %s290_s9 = sand.u32 (!%p285_p12), 1, %s2077_s25  }
  0x15   : > { %s1384_s11 = sshll.u32 (!%p285_p12), %s290_s9, 9  ;;  %s291_s15 = scalar_lea.sflag (!%p285_p12), [#allocation4], %s290_s9 }
  0x16   : > { %s2199_s17 = scalar_lea.vmem (!%p285_p12), [#allocation3], %s1384_s11 }
  0x19   : > { %2068 = dma.done.wait (%p2181_p7), %s291_s15, 8192  }
  0x1a   : > { %2070 = vsyncadd (%p2181_p7), %s291_s15, 4294959104  ;;  %s1385_s10 = sshll.u32 %s2085_s27, 2  ;;  %p1387_p0 = scmp.ne.s32.totalorder %s2085_s27, 0 }
  0x1b   : > { %p337_p13 = scmp.lt.s32.totalorder %s1385_s10, 7 }
  0x1c   : > { %352 = sbr.rel (%p1387_p0) target bundleno = 36 (0x24), region = 56 }
  0x1d   : > { %s2649_s10 = smov (!%p337_p13, %s1385_s10), 7 }
  0x1e   : > { %s1386_s14 = sshll.u32 %s2649_s10, 3 }
  0x1f   : > { %s2209_s19 = scalar_lea.vmem %s2631_s0, %s1386_s14 }
  0x21   : > { %v2097_v0 = vmov 0.0  }
  0x22   : > { %353 = vst [vmem:[#allocation2] sm:$0xff] %v2097_v0 }
  0x23   : > { %354 = vst [vmem:[#allocation2 + $0x8] sm:$0xff] %v2097_v0 }
  0x24 PF: > { %v1446_v1 = vld [vmem:[%s2199_s17 + $0x70] sm:$0xf]  ;;  %v1857_v2 = vld [vmem:[%s2199_s17 + $0x74] sm:$0xf0]  ;;  %v1438_v12 = vld [vmem:[%s2199_s17 + $0x60] sm:$0xf] }
  0x25   : > { %v1510_v3 = vld [vmem:[%s2199_s17 + $0xf0] sm:$0xf]  ;;  %v1447_v4 = vor.u32 %v1857_v2, %v1446_v1  ;;  %v1873_v5 = vld [vmem:[%s2199_s17 + $0xf4] sm:$0xf0]  ;;  %v1855_v14 = vld [vmem:[%s2199_s17 + $0x64] sm:$0xf0] }
  0x26   : > { %v1574_v6 = vld [vmem:[%s2199_s17 + $0x170] sm:$0xf]  ;;  %v1889_v7 = vld [vmem:[%s2199_s17 + $0x174] sm:$0xf0]  ;;  %v1511_v8 = vor.u32 %v1873_v5, %v1510_v3  ;;  %v1502_v15 = vld [vmem:[%s2199_s17 + $0xe0] sm:$0xf]  ;;  %v1439_v17 = vor.u32 %v1855_v14, %v1438_v12 }
  0x27   : > { %v1575_v9 = vor.u32 %v1889_v7, %v1574_v6  ;;  %v1638_v10 = vld [vmem:[%s2199_s17 + $0x1f0] sm:$0xf]  ;;  %v1905_v11 = vld [vmem:[%s2199_s17 + $0x1f4] sm:$0xf0]  ;;  %749 = vmatpush.bf16.msra.mxu0 %v1447_v4  ;;  %v1871_v16 = vld [vmem:[%s2199_s17 + $0xe4] sm:$0xf0] }
  0x28   : > { %v1639_v13 = vor.u32 %v1905_v11, %v1638_v10  ;;  %762 = vmatpush.bf16.msra.mxu1 %v1511_v8  ;;  %v1503_v18 = vor.u32 %v1871_v16, %v1502_v15  ;;  %v1566_v19 = vld [vmem:[%s2199_s17 + $0x160] sm:$0xf]  ;;  %v1887_v20 = vld [vmem:[%s2199_s17 + $0x164] sm:$0xf0]  ;;  %v1430_v24 = vld [vmem:[%s2199_s17 + $0x50] sm:$0xf] }
  0x29   : > { %775 = vmatpush.bf16.msra.mxu2 %v1575_v9  ;;  %v1630_v21 = vld [vmem:[%s2199_s17 + $0x1e0] sm:$0xf]  ;;  %v1567_v22 = vor.u32 %v1887_v20, %v1566_v19  ;;  %v1903_v23 = vld [vmem:[%s2199_s17 + $0x1e4] sm:$0xf0]  ;;  %v1853_v25 = vld [vmem:[%s2199_s17 + $0x54] sm:$0xf0] }
  0x2a   : > { %788 = vmatpush.bf16.msra.mxu3 %v1639_v13  ;;  %v1631_v26 = vor.u32 %v1903_v23, %v1630_v21  ;;  %v1494_v27 = vld [vmem:[%s2199_s17 + $0xd0] sm:$0xf]  ;;  %v1869_v28 = vld [vmem:[%s2199_s17 + $0xd4] sm:$0xf0]  ;;  %v1431_v30 = vor.u32 %v1853_v25, %v1430_v24  ;;  %v1422_v36 = vld [vmem:[%s2199_s17 + $0x40] sm:$0xf] }
  0x2b   : > { %v1558_v29 = vld [vmem:[%s2199_s17 + $0x150] sm:$0xf]  ;;  %750 = vmatpush.bf16.msra.mxu0 %v1439_v17  ;;  %v1885_v31 = vld [vmem:[%s2199_s17 + $0x154] sm:$0xf0]  ;;  %v1495_v34 = vor.u32 %v1869_v28, %v1494_v27  ;;  %v1851_v37 = vld [vmem:[%s2199_s17 + $0x44] sm:$0xf0] }
  0x2c   : > { %v1622_v32 = vld [vmem:[%s2199_s17 + $0x1d0] sm:$0xf]  ;;  %v1901_v33 = vld [vmem:[%s2199_s17 + $0x1d4] sm:$0xf0]  ;;  %763 = vmatpush.bf16.msra.mxu1 %v1503_v18  ;;  %v1559_v35 = vor.u32 %v1885_v31, %v1558_v29  ;;  %v1486_v38 = vld [vmem:[%s2199_s17 + $0xc0] sm:$0xf]  ;;  %v1423_v45 = vor.u32 %v1851_v37, %v1422_v36 }
  0x2d   : > { %776 = vmatpush.bf16.msra.mxu2 %v1567_v22  ;;  %v1623_v39 = vor.u32 %v1901_v33, %v1622_v32  ;;  %v1867_v40 = vld [vmem:[%s2199_s17 + $0xc4] sm:$0xf0]  ;;  %v1550_v41 = vld [vmem:[%s2199_s17 + $0x140] sm:$0xf]  ;;  %v1414_v48 = vld [vmem:[%s2199_s17 + $0x30] sm:$0xf] }
  0x2e   : > { %789 = vmatpush.bf16.msra.mxu3 %v1631_v26  ;;  %v1883_v42 = vld [vmem:[%s2199_s17 + $0x144] sm:$0xf0]  ;;  %v1614_v43 = vld [vmem:[%s2199_s17 + $0x1c0] sm:$0xf]  ;;  %v1487_v46 = vor.u32 %v1867_v40, %v1486_v38  ;;  %v1849_v49 = vld [vmem:[%s2199_s17 + $0x34] sm:$0xf0] }
  0x2f   : > { %v1899_v44 = vld [vmem:[%s2199_s17 + $0x1c4] sm:$0xf0]  ;;  %751 = vmatpush.bf16.msra.mxu0 %v1431_v30  ;;  %v1551_v47 = vor.u32 %v1883_v42, %v1550_v41  ;;  %v1478_v50 = vld [vmem:[%s2199_s17 + $0xb0] sm:$0xf]  ;;  %v1865_v52 = vld [vmem:[%s2199_s17 + $0xb4] sm:$0xf0]  ;;  %v1415_v57 = vor.u32 %v1849_v49, %v1414_v48 }
  0x30   : > { %764 = vmatpush.bf16.msra.mxu1 %v1495_v34  ;;  %v1615_v51 = vor.u32 %v1899_v44, %v1614_v43  ;;  %v1542_v53 = vld [vmem:[%s2199_s17 + $0x130] sm:$0xf]  ;;  %v1881_v54 = vld [vmem:[%s2199_s17 + $0x134] sm:$0xf0]  ;;  %v1479_v58 = vor.u32 %v1865_v52, %v1478_v50  ;;  %v1406_v60 = vld [vmem:[%s2199_s17 + $0x20] sm:$0xf] }
  0x31   : > { %777 = vmatpush.bf16.msra.mxu2 %v1559_v35  ;;  %v1606_v55 = vld [vmem:[%s2199_s17 + $0x1b0] sm:$0xf]  ;;  %v1897_v56 = vld [vmem:[%s2199_s17 + $0x1b4] sm:$0xf0]  ;;  %v1543_v59 = vor.u32 %v1881_v54, %v1542_v53  ;;  %v1847_v61 = vld [vmem:[%s2199_s17 + $0x24] sm:$0xf0] }
  0x32   : > { %790 = vmatpush.bf16.msra.mxu3 %v1623_v39  ;;  %v1470_v62 = vld [vmem:[%s2199_s17 + $0xa0] sm:$0xf]  ;;  %v1607_v63 = vor.u32 %v1897_v56, %v1606_v55  ;;  %v1863_v0 = vld [vmem:[%s2199_s17 + $0xa4] sm:$0xf0]  ;;  %v1407_v5 = vor.u32 %v1847_v61, %v1406_v60  ;;  %v1398_v8 = vld [vmem:[%s2199_s17 + $0x10] sm:$0xf] }
  0x33   : > { %752 = vmatpush.bf16.msra.mxu0 %v1423_v45  ;;  %v1534_v1 = vld [vmem:[%s2199_s17 + $0x120] sm:$0xf]  ;;  %v1879_v2 = vld [vmem:[%s2199_s17 + $0x124] sm:$0xf0]  ;;  %v1471_v6 = vor.u32 %v1863_v0, %v1470_v62  ;;  %v1845_v9 = vld [vmem:[%s2199_s17 + $0x14] sm:$0xf0] }
  0x34   : > { %765 = vmatpush.bf16.msra.mxu1 %v1487_v46  ;;  %v1598_v3 = vld [vmem:[%s2199_s17 + $0x1a0] sm:$0xf]  ;;  %v1895_v4 = vld [vmem:[%s2199_s17 + $0x1a4] sm:$0xf0]  ;;  %v1535_v7 = vor.u32 %v1879_v2, %v1534_v1  ;;  %v1462_v10 = vld [vmem:[%s2199_s17 + $0x90] sm:$0xf]  ;;  %v1399_v17 = vor.u32 %v1845_v9, %v1398_v8 }
  0x35   : > { %778 = vmatpush.bf16.msra.mxu2 %v1551_v47  ;;  %v1599_v11 = vor.u32 %v1895_v4, %v1598_v3  ;;  %v1861_v12 = vld [vmem:[%s2199_s17 + $0x94] sm:$0xf0]  ;;  %v1526_v13 = vld [vmem:[%s2199_s17 + $0x110] sm:$0xf]  ;;  %v1390_v18 = vld [vmem:[%s2199_s17] sm:$0xf] }
  0x36   : > { %791 = vmatpush.bf16.msra.mxu3 %v1615_v51  ;;  %v1877_v14 = vld [vmem:[%s2199_s17 + $0x114] sm:$0xf0]  ;;  %v1590_v15 = vld [vmem:[%s2199_s17 + $0x190] sm:$0xf]  ;;  %v1843_v19 = vld [vmem:[%s2199_s17 + $0x4] sm:$0xf0]  ;;  %v1463_v20 = vor.u32 %v1861_v12, %v1462_v10 }
  0x37   : > { %753 = vmatpush.bf16.msra.mxu0 %v1415_v57  ;;  %v1893_v16 = vld [vmem:[%s2199_s17 + $0x194] sm:$0xf0]  ;;  %v1527_v21 = vor.u32 %v1877_v14, %v1526_v13  ;;  %v1454_v22 = vld [vmem:[%s2199_s17 + $0x80] sm:$0xf]  ;;  %v1859_v23 = vld [vmem:[%s2199_s17 + $0x84] sm:$0xf0]  ;;  %v1391_v32 = vor.u32 %v1843_v19, %v1390_v18 }
  0x38   : > { %766 = vmatpush.bf16.msra.mxu1 %v1479_v58  ;;  %v1518_v24 = vld [vmem:[%s2199_s17 + $0x100] sm:$0xf]  ;;  %v1591_v25 = vor.u32 %v1893_v16, %v1590_v15  ;;  %v1875_v26 = vld [vmem:[%s2199_s17 + $0x104] sm:$0xf0]  ;;  %v1856_v29 = vld [vmem:[%s2199_s17 + $0x74] sm:$0xf]  ;;  %v1455_v36 = vor.u32 %v1859_v23, %v1454_v22 }
  0x39   : > { %779 = vmatpush.bf16.msra.mxu2 %v1543_v59  ;;  %v1582_v27 = vld [vmem:[%s2199_s17 + $0x180] sm:$0xf]  ;;  %v1891_v28 = vld [vmem:[%s2199_s17 + $0x184] sm:$0xf0]  ;;  %v1448_v30 = vld [vmem:[%s2199_s17 + $0x78] sm:$0xf0]  ;;  %v1519_v37 = vor.u32 %v1875_v26, %v1518_v24 }
  0x3a   : > { %792 = vmatpush.bf16.msra.mxu3 %v1607_v63  ;;  %v1872_v31 = vld [vmem:[%s2199_s17 + $0xf4] sm:$0xf]  ;;  %v1512_v33 = vld [vmem:[%s2199_s17 + $0xf8] sm:$0xf0]  ;;  %v359_v40 = vld [vmem:[%s2209_s19 + $0x10] sm:$0xff]  ;;  %v1583_v41 = vor.u32 %v1891_v28, %v1582_v27  ;;  %v1451_v42 = vor.u32 %v1856_v29, %v1448_v30  ;;  %p1644_p1 = scmp.ne.s32.totalorder %s2085_s27, 1 }
  0x3b   : > { %754 = vmatpush.bf16.msra.mxu0 %v1407_v5  ;;  %v1888_v34 = vld [vmem:[%s2199_s17 + $0x174] sm:$0xf]  ;;  %v1576_v35 = vld [vmem:[%s2199_s17 + $0x178] sm:$0xf0]  ;;  %v1854_v43 = vld [vmem:[%s2199_s17 + $0x64] sm:$0xf]  ;;  %v1515_v46 = vor.u32 %v1872_v31, %v1512_v33  ;;  %v2294_v55 = vpack.c.bf16 %v359_v40, %v359_v40 }
  0x3c   : > { %767 = vmatpush.bf16.msra.mxu1 %v1471_v6  ;;  %v1904_v38 = vld [vmem:[%s2199_s17 + $0x1f4] sm:$0xf]  ;;  %v1640_v39 = vld [vmem:[%s2199_s17 + $0x1f8] sm:$0xf0]  ;;  %v1440_v44 = vld [vmem:[%s2199_s17 + $0x68] sm:$0xf0]  ;;  %v1579_v47 = vor.u32 %v1888_v34, %v1576_v35 }
  0x3d   : > { %780 = vmatpush.bf16.msra.mxu2 %v1535_v7  ;;  %v360_v45 = vld [vmem:[%s2209_s19 + $0x18] sm:$0xff]  ;;  %v1870_v48 = vld [vmem:[%s2199_s17 + $0xe4] sm:$0xf]  ;;  %v357_v49 = vld [vmem:[%s2209_s19] sm:$0xff]  ;;  %v1643_v51 = vor.u32 %v1904_v38, %v1640_v39  ;;  %v1443_v60 = vor.u32 %v1854_v43, %v1440_v44 }
  0x3e   : > { %793 = vmatpush.bf16.msra.mxu3 %v1599_v11  ;;  %v358_v50 = vld [vmem:[%s2209_s19 + $0x8] sm:$0xff]  ;;  %v1504_v52 = vld [vmem:[%s2199_s17 + $0xe8] sm:$0xf0]  ;;  %v1886_v53 = vld [vmem:[%s2199_s17 + $0x164] sm:$0xf]  ;;  %v2298_v58 = vpack.c.bf16 %v360_v45, %v360_v45  ;;  %v2300_v59 = vpack.c.bf16 %v357_v49, %v357_v49 }
  0x3f   : > { %755 = vmatpush.bf16.msra.mxu0 %v1399_v17  ;;  %v1568_v54 = vld [vmem:[%s2199_s17 + $0x168] sm:$0xf0]  ;;  %v1902_v56 = vld [vmem:[%s2199_s17 + $0x1e4] sm:$0xf]  ;;  %v2302_v61 = vpack.c.bf16 %v358_v50, %v358_v50  ;;  %v1507_v62 = vor.u32 %v1870_v48, %v1504_v52  ;;  %v1852_v0 = vld [vmem:[%s2199_s17 + $0x54] sm:$0xf] }
  0x40   : > { %768 = vmatpush.bf16.msra.mxu1 %v1463_v20  ;;  %v1632_v57 = vld [vmem:[%s2199_s17 + $0x1e8] sm:$0xf0]  ;;  %v1571_v63 = vor.u32 %v1886_v53, %v1568_v54  ;;  %v1432_v1 = vld [vmem:[%s2199_s17 + $0x58] sm:$0xf0]  ;;  %v1868_v2 = vld [vmem:[%s2199_s17 + $0xd4] sm:$0xf] }
  0x41   : > { %781 = vmatpush.bf16.msra.mxu2 %v1527_v21  ;;  %v1635_v3 = vor.u32 %v1902_v56, %v1632_v57  ;;  %v1496_v4 = vld [vmem:[%s2199_s17 + $0xd8] sm:$0xf0]  ;;  %v1884_v5 = vld [vmem:[%s2199_s17 + $0x154] sm:$0xf]  ;;  %v1435_v9 = vor.u32 %v1852_v0, %v1432_v1  ;;  %v1850_v12 = vld [vmem:[%s2199_s17 + $0x44] sm:$0xf] }
  0x42   : > { %794 = vmatpush.bf16.msra.mxu3 %v1591_v25  ;;  %v1560_v6 = vld [vmem:[%s2199_s17 + $0x158] sm:$0xf0]  ;;  %v1900_v7 = vld [vmem:[%s2199_s17 + $0x1d4] sm:$0xf]  ;;  %v1499_v10 = vor.u32 %v1868_v2, %v1496_v4  ;;  %v1424_v13 = vld [vmem:[%s2199_s17 + $0x48] sm:$0xf0] }
  0x43   : > { %756 = vmatpush.bf16.msra.mxu0 %v1391_v32  ;;  %v1624_v8 = vld [vmem:[%s2199_s17 + $0x1d8] sm:$0xf0]  ;;  %v1563_v11 = vor.u32 %v1884_v5, %v1560_v6  ;;  %v1866_v14 = vld [vmem:[%s2199_s17 + $0xc4] sm:$0xf]  ;;  %v1488_v16 = vld [vmem:[%s2199_s17 + $0xc8] sm:$0xf0]  ;;  %v1427_v21 = vor.u32 %v1850_v12, %v1424_v13 }
  0x44   : > { %769 = vmatpush.bf16.msra.mxu1 %v1455_v36  ;;  %v1627_v15 = vor.u32 %v1900_v7, %v1624_v8  ;;  %v1882_v17 = vld [vmem:[%s2199_s17 + $0x144] sm:$0xf]  ;;  %v1552_v18 = vld [vmem:[%s2199_s17 + $0x148] sm:$0xf0]  ;;  %v1491_v22 = vor.u32 %v1866_v14, %v1488_v16  ;;  %v1848_v24 = vld [vmem:[%s2199_s17 + $0x34] sm:$0xf] }
  0x45   : > { %782 = vmatpush.bf16.msra.mxu2 %v1519_v37  ;;  %v1898_v19 = vld [vmem:[%s2199_s17 + $0x1c4] sm:$0xf]  ;;  %v1616_v20 = vld [vmem:[%s2199_s17 + $0x1c8] sm:$0xf0]  ;;  %v1555_v23 = vor.u32 %v1882_v17, %v1552_v18  ;;  %v1416_v25 = vld [vmem:[%s2199_s17 + $0x38] sm:$0xf0] }
  0x46   : > { %795 = vmatpush.bf16.msra.mxu3 %v1583_v41  ;;  %757 = vmatmul.bf16.vlgmr.msra.gmra.mxu0 %v2300_v59  ;;  %v1864_v26 = vld [vmem:[%s2199_s17 + $0xb4] sm:$0xf]  ;;  %v1619_v27 = vor.u32 %v1898_v19, %v1616_v20  ;;  %v1480_v28 = vld [vmem:[%s2199_s17 + $0xb8] sm:$0xf0]  ;;  %v1419_v33 = vor.u32 %v1848_v24, %v1416_v25  ;;  %v1846_v36 = vld [vmem:[%s2199_s17 + $0x24] sm:$0xf] }
  0x47   : > { %801 = vmatpush.bf16.msrb.mxu0 %v1451_v42  ;;  %770 = vmatmul.bf16.vlgmr.msra.gmra.mxu1 %v2302_v61  ;;  %v1880_v29 = vld [vmem:[%s2199_s17 + $0x134] sm:$0xf]  ;;  %v1544_v30 = vld [vmem:[%s2199_s17 + $0x138] sm:$0xf0]  ;;  %v1483_v34 = vor.u32 %v1864_v26, %v1480_v28  ;;  %v1408_v37 = vld [vmem:[%s2199_s17 + $0x28] sm:$0xf0] }
  0x48   : > { %814 = vmatpush.bf16.msrb.mxu1 %v1515_v46  ;;  %783 = vmatmul.bf16.vlgmr.msra.gmra.mxu2 %v2294_v55  ;;  %v1896_v31 = vld [vmem:[%s2199_s17 + $0x1b4] sm:$0xf]  ;;  %v1608_v32 = vld [vmem:[%s2199_s17 + $0x1b8] sm:$0xf0]  ;;  %v1547_v35 = vor.u32 %v1880_v29, %v1544_v30  ;;  %v1862_v38 = vld [vmem:[%s2199_s17 + $0xa4] sm:$0xf]  ;;  %v1411_v45 = vor.u32 %v1846_v36, %v1408_v37 }
  0x49   : > { %827 = vmatpush.bf16.msrb.mxu2 %v1579_v47  ;;  %796 = vmatmul.bf16.vlgmr.msra.gmra.mxu3 %v2298_v58  ;;  %v1611_v39 = vor.u32 %v1896_v31, %v1608_v32  ;;  %v1472_v40 = vld [vmem:[%s2199_s17 + $0xa8] sm:$0xf0]  ;;  %v1878_v41 = vld [vmem:[%s2199_s17 + $0x124] sm:$0xf]  ;;  %v1844_v48 = vld [vmem:[%s2199_s17 + $0x14] sm:$0xf] }
  0x4a   : > { %840 = vmatpush.bf16.msrb.mxu3 %v1643_v51  ;;  %v1536_v42 = vld [vmem:[%s2199_s17 + $0x128] sm:$0xf0]  ;;  %v1894_v43 = vld [vmem:[%s2199_s17 + $0x1a4] sm:$0xf]  ;;  %v1475_v46 = vor.u32 %v1862_v38, %v1472_v40  ;;  %v1400_v49 = vld [vmem:[%s2199_s17 + $0x18] sm:$0xf0] }
  0x4b   : > { %802 = vmatpush.bf16.msrb.mxu0 %v1443_v60  ;;  %v1600_v44 = vld [vmem:[%s2199_s17 + $0x1a8] sm:$0xf0]  ;;  %v1539_v47 = vor.u32 %v1878_v41, %v1536_v42  ;;  %v1860_v50 = vld [vmem:[%s2199_s17 + $0x94] sm:$0xf]  ;;  %v1464_v52 = vld [vmem:[%s2199_s17 + $0x98] sm:$0xf0]  ;;  %v1403_v60 = vor.u32 %v1844_v48, %v1400_v49 }
  0x4c   : > { %815 = vmatpush.bf16.msrb.mxu1 %v1507_v62  ;;  %v1603_v51 = vor.u32 %v1894_v43, %v1600_v44  ;;  %v1876_v53 = vld [vmem:[%s2199_s17 + $0x114] sm:$0xf]  ;;  %v1528_v54 = vld [vmem:[%s2199_s17 + $0x118] sm:$0xf0]  ;;  %v1467_v62 = vor.u32 %v1860_v50, %v1464_v52  ;;  %v1842_v0 = vld [vmem:[%s2199_s17 + $0x4] sm:$0xf] }
  0x4d   : > { %828 = vmatpush.bf16.msrb.mxu2 %v1571_v63  ;;  %v1892_v56 = vld [vmem:[%s2199_s17 + $0x194] sm:$0xf]  ;;  %v1592_v57 = vld [vmem:[%s2199_s17 + $0x198] sm:$0xf0]  ;;  %v1531_v63 = vor.u32 %v1876_v53, %v1528_v54  ;;  %v1392_v1 = vld [vmem:[%s2199_s17 + $0x8] sm:$0xf0] }
  0x4e   : > { %841 = vmatpush.bf16.msrb.mxu3 %v1635_v3  ;;  %v1858_v2 = vld [vmem:[%s2199_s17 + $0x84] sm:$0xf]  ;;  %v1595_v3 = vor.u32 %v1892_v56, %v1592_v57  ;;  %v1456_v4 = vld [vmem:[%s2199_s17 + $0x88] sm:$0xf0]  ;;  %v355_v19 = vld [vmem:[#allocation2] sm:$0xff] }
  0x4f   : > { %803 = vmatpush.bf16.msrb.mxu0 %v1435_v9  ;;  %v1874_v5 = vld [vmem:[%s2199_s17 + $0x104] sm:$0xf]  ;;  %v1520_v6 = vld [vmem:[%s2199_s17 + $0x108] sm:$0xf0]  ;;  %v1395_v9 = vor.u32 %v1842_v0, %v1392_v1  ;;  %v356_v29 = vld [vmem:[#allocation2 + $0x8] sm:$0xff] }
  0x50   : > { %816 = vmatpush.bf16.msrb.mxu1 %v1499_v10  ;;  %v1890_v7 = vld [vmem:[%s2199_s17 + $0x184] sm:$0xf]  ;;  %v1584_v8 = vld [vmem:[%s2199_s17 + $0x188] sm:$0xf0]  ;;  %v1459_v10 = vor.u32 %v1858_v2, %v1456_v4 }
  0x51   : > { %829 = vmatpush.bf16.msrb.mxu2 %v1563_v11  ;;  %v1523_v11 = vor.u32 %v1874_v5, %v1520_v6  ;;  %v1587_v12 = vor.u32 %v1890_v7, %v1584_v8 }
  0x52   : > { %842 = vmatpush.bf16.msrb.mxu3 %v1627_v15 }
  0x53   : > { %804 = vmatpush.bf16.msrb.mxu0 %v1427_v21 }
  0x54   : > { %817 = vmatpush.bf16.msrb.mxu1 %v1491_v22 }
  0x55   : > { %830 = vmatpush.bf16.msrb.mxu2 %v1555_v23 }
  0x56   : > { %843 = vmatpush.bf16.msrb.mxu3 %v1619_v27 }
  0x57   : > { %805 = vmatpush.bf16.msrb.mxu0 %v1419_v33 }
  0x58   : > { %818 = vmatpush.bf16.msrb.mxu1 %v1483_v34 }
  0x59   : > { %831 = vmatpush.bf16.msrb.mxu2 %v1547_v35 }
  0x5a   : > { %844 = vmatpush.bf16.msrb.mxu3 %v1611_v39 }
  0x5b   : > { %806 = vmatpush.bf16.msrb.mxu0 %v1411_v45 }
  0x5c   : > { %819 = vmatpush.bf16.msrb.mxu1 %v1475_v46 }
  0x5d   : > { %832 = vmatpush.bf16.msrb.mxu2 %v1539_v47 }
  0x5e   : > { %845 = vmatpush.bf16.msrb.mxu3 %v1603_v51 }
  0x5f   : > { %807 = vmatpush.bf16.msrb.mxu0 %v1403_v60 }
  0x60   : > { %820 = vmatpush.bf16.msrb.mxu1 %v1467_v62 }
  0x61   : > { %833 = vmatpush.bf16.msrb.mxu2 %v1531_v63 }
  0x62   : > { %846 = vmatpush.bf16.msrb.mxu3 %v1595_v3 }
  0x63   : > { %808 = vmatpush.bf16.msrb.mxu0 %v1395_v9 }
  0x64   : > { %821 = vmatpush.bf16.msrb.mxu1 %v1459_v10 }
  0x65   : > { %834 = vmatpush.bf16.msrb.mxu2 %v1523_v11 }
  0x66   : > { %847 = vmatpush.bf16.msrb.mxu3 %v1587_v12  ;;  %809 = vmatmul.bf16.vlgmr.msrb.gmra.mxu0 %v2300_v59 }
  0x67   : > { %822 = vmatmul.bf16.vlgmr.msrb.gmra.mxu1 %v2302_v61 }
  0x68   : > { %835 = vmatmul.bf16.vlgmr.msrb.gmra.mxu2 %v2294_v55 }
  0x69   : > { %848 = vmatmul.bf16.vlgmr.msrb.gmra.mxu3 %v2298_v58 }
  0xc3   : > { %v758_v13 = vpop.f32.mrf.mxu0 }
  0xc4   : > { %v771_v14 = vpop.f32.mrf.mxu1 }
  0xc5   : > { %v772_v15 = vadd.f32 %v771_v14, %v758_v13 }
  0xcb   : > { %v784_v16 = vpop.f32.mrf.mxu2  ;;  %v760_v21 = vpop.f32.mrf.mxu0 }
  0xcc   : > { %v785_v17 = vadd.f32 %v784_v16, %v772_v15  ;;  %v797_v18 = vpop.f32.mrf.mxu3  ;;  %v773_v22 = vpop.f32.mrf.mxu1 }
  0xce   : > { %v798_v20 = vadd.f32 %v797_v18, %v785_v17 }
  0xd0   : > { %v853_v23 = vadd.f32 %v798_v20, %v355_v19 }
  0xd2   : > { %855 = vst [vmem:[#allocation2] sm:$0xff] %v853_v23 }
  0xd3   : > { %v786_v24 = vpop.f32.mrf.mxu2 }
  0xd4   : > { %v799_v59 = vpop.f32.mrf.mxu3 }
  0xe3   : > { %v810_v25 = vpop.f32.mrf.mxu0 }
  0xe4   : > { %v823_v61 = vpop.f32.mrf.mxu1 }
  0xe5   : > { %v824_v26 = vadd.f32 %v823_v61, %v810_v25 }
  0xeb   : > { %v836_v55 = vpop.f32.mrf.mxu2  ;;  %v812_v28 = vpop.f32.mrf.mxu0 }
  0xec   : > { %v837_v27 = vadd.f32 %v836_v55, %v824_v26  ;;  %v849_v58 = vpop.f32.mrf.mxu3  ;;  %v825_v30 = vpop.f32.mrf.mxu1 }
  0xee   : > { %v850_v31 = vadd.f32 %v849_v58, %v837_v27 }
  0xf0   : > { %v854_v32 = vadd.f32 %v850_v31, %v356_v29  ;;  %860 = sbr.rel (%p1644_p1) target bundleno = 555 (0x22b), region = 60 }
  0xf2   : > { %856 = vst [vmem:[#allocation2 + $0x8] sm:$0xff] %v854_v32 }
  0xf3   : > { %v838_v33 = vpop.f32.mrf.mxu2 }
  0xf4   : > { %v851_v34 = vpop.f32.mrf.mxu3 }
  0xf5   : > { %v1703_v35 = vld [vmem:[%s2634_s3 + $0x70] sm:$0xf]  ;;  %v1921_v36 = vld [vmem:[%s2634_s3 + $0x74] sm:$0xf0]  ;;  %v1920_v40 = vld [vmem:[%s2634_s3 + $0x74] sm:$0xf] }
  0xf6   : > { %v1767_v37 = vld [vmem:[%s2634_s3 + $0xf0] sm:$0xf]  ;;  %v1704_v38 = vor.u32 %v1921_v36, %v1703_v35  ;;  %v1937_v39 = vld [vmem:[%s2634_s3 + $0xf4] sm:$0xf0]  ;;  %v1705_v41 = vld [vmem:[%s2634_s3 + $0x78] sm:$0xf0] }
  0xf7   : > { %v1768_v42 = vor.u32 %v1937_v39, %v1767_v37  ;;  %v1708_v43 = vor.u32 %v1920_v40, %v1705_v41  ;;  %v1936_v44 = vld [vmem:[%s2634_s3 + $0xf4] sm:$0xf]  ;;  %v1769_v45 = vld [vmem:[%s2634_s3 + $0xf8] sm:$0xf0]  ;;  %v1695_v46 = vld [vmem:[%s2634_s3 + $0x60] sm:$0xf] }
  0xf8   : > { %1073 = vmatpush.bf16.msra.mxu0 %v1704_v38  ;;  %v1772_v47 = vor.u32 %v1936_v44, %v1769_v45  ;;  %v1919_v48 = vld [vmem:[%s2634_s3 + $0x64] sm:$0xf0]  ;;  %v1759_v49 = vld [vmem:[%s2634_s3 + $0xe0] sm:$0xf]  ;;  %v1918_v53 = vld [vmem:[%s2634_s3 + $0x64] sm:$0xf] }
  0xf9   : > { %v1935_v50 = vld [vmem:[%s2634_s3 + $0xe4] sm:$0xf0]  ;;  %1086 = vmatpush.bf16.msra.mxu1 %v1768_v42  ;;  %1099 = vmatpush.bf16.msra.mxu2 %v1708_v43  ;;  %v1696_v51 = vor.u32 %v1919_v48, %v1695_v46  ;;  %v1697_v54 = vld [vmem:[%s2634_s3 + $0x68] sm:$0xf0]  ;;  %v1934_v56 = vld [vmem:[%s2634_s3 + $0xe4] sm:$0xf] }
  0xfa   : > { %v1760_v52 = vor.u32 %v1935_v50, %v1759_v49  ;;  %1112 = vmatpush.bf16.msra.mxu3 %v1772_v47  ;;  %v1700_v57 = vor.u32 %v1918_v53, %v1697_v54  ;;  %v1761_v60 = vld [vmem:[%s2634_s3 + $0xe8] sm:$0xf0]  ;;  %v1687_v62 = vld [vmem:[%s2634_s3 + $0x50] sm:$0xf]  ;;  %v1917_v63 = vld [vmem:[%s2634_s3 + $0x54] sm:$0xf0] }
  0xfb   : > { %v1764_v0 = vor.u32 %v1934_v56, %v1761_v60  ;;  %v1751_v1 = vld [vmem:[%s2634_s3 + $0xd0] sm:$0xf]  ;;  %v1933_v2 = vld [vmem:[%s2634_s3 + $0xd4] sm:$0xf0]  ;;  %v1916_v3 = vld [vmem:[%s2634_s3 + $0x54] sm:$0xf]  ;;  %v1688_v4 = vor.u32 %v1917_v63, %v1687_v62 }
  0xfc   : > { %1074 = vmatpush.bf16.msra.mxu0 %v1696_v51  ;;  %v1689_v5 = vld [vmem:[%s2634_s3 + $0x58] sm:$0xf0]  ;;  %v1932_v6 = vld [vmem:[%s2634_s3 + $0xd4] sm:$0xf]  ;;  %v1752_v8 = vor.u32 %v1933_v2, %v1751_v1  ;;  %v1679_v10 = vld [vmem:[%s2634_s3 + $0x40] sm:$0xf] }
  0xfd   : > { %v1753_v7 = vld [vmem:[%s2634_s3 + $0xd8] sm:$0xf0]  ;;  %1087 = vmatpush.bf16.msra.mxu1 %v1760_v52  ;;  %1100 = vmatpush.bf16.msra.mxu2 %v1700_v57  ;;  %v1692_v9 = vor.u32 %v1916_v3, %v1689_v5  ;;  %v1915_v11 = vld [vmem:[%s2634_s3 + $0x44] sm:$0xf0]  ;;  %v1743_v12 = vld [vmem:[%s2634_s3 + $0xc0] sm:$0xf] }
  0xfe   : > { %1113 = vmatpush.bf16.msra.mxu3 %v1764_v0  ;;  %v1756_v13 = vor.u32 %v1932_v6, %v1753_v7  ;;  %v1931_v14 = vld [vmem:[%s2634_s3 + $0xc4] sm:$0xf0]  ;;  %v1914_v15 = vld [vmem:[%s2634_s3 + $0x44] sm:$0xf]  ;;  %v1681_v16 = vld [vmem:[%s2634_s3 + $0x48] sm:$0xf0]  ;;  %v1680_v19 = vor.u32 %v1915_v11, %v1679_v10 }
  0xff   : > { %v1930_v17 = vld [vmem:[%s2634_s3 + $0xc4] sm:$0xf]  ;;  %v1745_v18 = vld [vmem:[%s2634_s3 + $0xc8] sm:$0xf0]  ;;  %v1744_v20 = vor.u32 %v1931_v14, %v1743_v12  ;;  %v1684_v21 = vor.u32 %v1914_v15, %v1681_v16  ;;  %v1671_v22 = vld [vmem:[%s2634_s3 + $0x30] sm:$0xf] }
 0x100   : > { %1075 = vmatpush.bf16.msra.mxu0 %v1688_v4  ;;  %v1913_v23 = vld [vmem:[%s2634_s3 + $0x34] sm:$0xf0]  ;;  %v1735_v24 = vld [vmem:[%s2634_s3 + $0xb0] sm:$0xf]  ;;  %v1748_v59 = vor.u32 %v1930_v17, %v1745_v18  ;;  %v1912_v61 = vld [vmem:[%s2634_s3 + $0x34] sm:$0xf] }
 0x101   : > { %1088 = vmatpush.bf16.msra.mxu1 %v1752_v8  ;;  %1101 = vmatpush.bf16.msra.mxu2 %v1692_v9  ;;  %v1929_v25 = vld [vmem:[%s2634_s3 + $0xb4] sm:$0xf0]  ;;  %v1673_v26 = vld [vmem:[%s2634_s3 + $0x38] sm:$0xf0]  ;;  %v1928_v55 = vld [vmem:[%s2634_s3 + $0xb4] sm:$0xf]  ;;  %v1672_v58 = vor.u32 %v1913_v23, %v1671_v22 }
 0x102   : > { %1114 = vmatpush.bf16.msra.mxu3 %v1756_v13  ;;  %v1737_v27 = vld [vmem:[%s2634_s3 + $0xb8] sm:$0xf0]  ;;  %v1736_v28 = vor.u32 %v1929_v25, %v1735_v24  ;;  %v1676_v29 = vor.u32 %v1912_v61, %v1673_v26  ;;  %v1663_v30 = vld [vmem:[%s2634_s3 + $0x20] sm:$0xf]  ;;  %v1911_v31 = vld [vmem:[%s2634_s3 + $0x24] sm:$0xf0] }
 0x103   : > { %v1727_v32 = vld [vmem:[%s2634_s3 + $0xa0] sm:$0xf]  ;;  %v1740_v33 = vor.u32 %v1928_v55, %v1737_v27  ;;  %v1927_v34 = vld [vmem:[%s2634_s3 + $0xa4] sm:$0xf0]  ;;  %v1910_v35 = vld [vmem:[%s2634_s3 + $0x24] sm:$0xf]  ;;  %v1664_v39 = vor.u32 %v1911_v31, %v1663_v30 }
 0x104   : > { %1076 = vmatpush.bf16.msra.mxu0 %v1680_v19  ;;  %v1665_v36 = vld [vmem:[%s2634_s3 + $0x28] sm:$0xf0]  ;;  %v1926_v37 = vld [vmem:[%s2634_s3 + $0xa4] sm:$0xf]  ;;  %v1655_v40 = vld [vmem:[%s2634_s3 + $0x10] sm:$0xf]  ;;  %v1728_v43 = vor.u32 %v1927_v34, %v1727_v32 }
 0x105   : > { %1089 = vmatpush.bf16.msra.mxu1 %v1744_v20  ;;  %1102 = vmatpush.bf16.msra.mxu2 %v1684_v21  ;;  %v1729_v38 = vld [vmem:[%s2634_s3 + $0xa8] sm:$0xf0]  ;;  %v1909_v41 = vld [vmem:[%s2634_s3 + $0x14] sm:$0xf0]  ;;  %v1719_v42 = vld [vmem:[%s2634_s3 + $0x90] sm:$0xf]  ;;  %v1668_v44 = vor.u32 %v1910_v35, %v1665_v36 }
 0x106   : > { %1115 = vmatpush.bf16.msra.mxu3 %v1748_v59  ;;  %v1925_v45 = vld [vmem:[%s2634_s3 + $0x94] sm:$0xf0]  ;;  %v1908_v46 = vld [vmem:[%s2634_s3 + $0x14] sm:$0xf]  ;;  %v1657_v47 = vld [vmem:[%s2634_s3 + $0x18] sm:$0xf0]  ;;  %v1732_v48 = vor.u32 %v1926_v37, %v1729_v38  ;;  %v1656_v57 = vor.u32 %v1909_v41, %v1655_v40 }
 0x107   : > { %v1924_v49 = vld [vmem:[%s2634_s3 + $0x94] sm:$0xf]  ;;  %v861_v50 = vld [vmem:[#allocation2] sm:$0xff]  ;;  %v1721_v52 = vld [vmem:[%s2634_s3 + $0x98] sm:$0xf0]  ;;  %v1720_v60 = vor.u32 %v1925_v45, %v1719_v42  ;;  %v1660_v63 = vor.u32 %v1908_v46, %v1657_v47 }
 0x108   : > { %1077 = vmatpush.bf16.msra.mxu0 %v1672_v58  ;;  %v863_v51 = vld [vmem:[%s2633_s2] sm:$0x3]  ;;  %v862_v54 = vld [vmem:[#allocation2 + $0x8] sm:$0xff]  ;;  %v1724_v5 = vor.u32 %v1924_v49, %v1721_v52  ;;  %v1906_v6 = vld [vmem:[%s2634_s3 + $0x4] sm:$0xf] }
 0x109   : > { %1090 = vmatpush.bf16.msra.mxu1 %v1736_v28  ;;  %1103 = vmatpush.bf16.msra.mxu2 %v1676_v29  ;;  %v865_v53 = vperm.slane %v863_v51, 0  ;;  %v866_v56 = vperm.slane %v863_v51, 1  ;;  %v1647_v62 = vld [vmem:[%s2634_s3] sm:$0xf]  ;;  %v1907_v0 = vld [vmem:[%s2634_s3 + $0x4] sm:$0xf0] }
 0x10a   : > { %1116 = vmatpush.bf16.msra.mxu3 %v1740_v33  ;;  %v1711_v1 = vld [vmem:[%s2634_s3 + $0x80] sm:$0xf]  ;;  %v1923_v2 = vld [vmem:[%s2634_s3 + $0x84] sm:$0xf0]  ;;  %v1649_v7 = vld [vmem:[%s2634_s3 + $0x8] sm:$0xf0]  ;;  %v1648_v11 = vor.u32 %v1907_v0, %v1647_v62 }
 0x10b   : > { %v869_v3 = vadd.f32 %v865_v53, %v861_v50  ;;  %v870_v4 = vadd.f32 %v866_v56, %v862_v54  ;;  %v1922_v8 = vld [vmem:[%s2634_s3 + $0x84] sm:$0xf]  ;;  %v1713_v9 = vld [vmem:[%s2634_s3 + $0x88] sm:$0xf0]  ;;  %v1712_v13 = vor.u32 %v1923_v2, %v1711_v1  ;;  %v1652_v14 = vor.u32 %v1906_v6, %v1649_v7  ;;  %v1945_v16 = vld [vmem:[%s2636_s5 + $0x38] sm:$0xff] }
 0x10c   : > { %1078 = vmatpush.bf16.msra.mxu0 %v1664_v39  ;;  %v1716_v15 = vor.u32 %v1922_v8, %v1713_v9  ;;  %v1953_v18 = vld [vmem:[%s2636_s5 + $0x78] sm:$0xff]  ;;  %v1944_v20 = vld [vmem:[%s2636_s5 + $0x30] sm:$0xff]  ;;  %v1943_v22 = vld [vmem:[%s2636_s5 + $0x28] sm:$0xff] }
 0x10d   : > { %1091 = vmatpush.bf16.msra.mxu1 %v1728_v43  ;;  %1104 = vmatpush.bf16.msra.mxu2 %v1668_v44  ;;  %v871_v10 = vmax.f32 %v869_v3, 0.0  ;;  %v872_v12 = vmax.f32 %v870_v4, 0.0  ;;  %v1952_v21 = vld [vmem:[%s2636_s5 + $0x70] sm:$0xff]  ;;  %v1951_v23 = vld [vmem:[%s2636_s5 + $0x68] sm:$0xff]  ;;  %v1942_v24 = vld [vmem:[%s2636_s5 + $0x20] sm:$0xff] }
 0x10e   : > { %1117 = vmatpush.bf16.msra.mxu3 %v1732_v48  ;;  %v1950_v59 = vld [vmem:[%s2636_s5 + $0x60] sm:$0xff]  ;;  %v1941_v25 = vld [vmem:[%s2636_s5 + $0x18] sm:$0xff]  ;;  %v1940_v61 = vld [vmem:[%s2636_s5 + $0x10] sm:$0xff] }
 0x10f   : > { %v873_v17 = vpack.c.bf16 %v871_v10, %v871_v10  ;;  %v874_v19 = vpack.c.bf16 %v872_v12, %v872_v12  ;;  %v1949_v26 = vld [vmem:[%s2636_s5 + $0x58] sm:$0xff]  ;;  %v1939_v55 = vld [vmem:[%s2636_s5 + $0x8] sm:$0xff]  ;;  %v1948_v27 = vld [vmem:[%s2636_s5 + $0x50] sm:$0xff] }
 0x110   : > { %1079 = vmatpush.bf16.msra.mxu0 %v1656_v57  ;;  %v1938_v58 = vld [vmem:[%s2636_s5] sm:$0xff]  ;;  %v1947_v28 = vld [vmem:[%s2636_s5 + $0x48] sm:$0xff] }
 0x111   : > { %1092 = vmatpush.bf16.msra.mxu1 %v1720_v60  ;;  %1105 = vmatpush.bf16.msra.mxu2 %v1660_v63  ;;  %v1946_v29 = vld [vmem:[%s2636_s5 + $0x40] sm:$0xff] }
 0x112   : > { %1118 = vmatpush.bf16.msra.mxu3 %v1724_v5  ;;  %v907_v30 = vld [vmem:[%s2635_s4] sm:$0x3] }
 0x113   : > { %v909_v31 = vperm.slane %v907_v30, 0  ;;  %v910_v36 = vperm.slane %v907_v30, 1  ;;  %v2012_v49 = vld [vmem:[%s2637_s6] ss:$0 sm:$0xff] }
 0x114   : > { %1080 = vmatpush.bf16.msra.mxu0 %v1648_v11 }
 0x115   : > { %1093 = vmatpush.bf16.msra.mxu1 %v1712_v13  ;;  %1106 = vmatpush.bf16.msra.mxu2 %v1652_v14 }
 0x116   : > { %1119 = vmatpush.bf16.msra.mxu3 %v1716_v15 }
 0x117   : > { %1081 = vmatmul.bf16.vlgmr.msra.gmra.mxu0 %v873_v17 }
 0x118   : > { %1261 = vmatpush.bf16.msrb.mxu0 %v1945_v16  ;;  %1094 = vmatmul.bf16.vlgmr.msra.gmra.mxu1 %v874_v19 }
 0x119   : > { %1274 = vmatpush.bf16.msrb.mxu1 %v1953_v18  ;;  %1107 = vmatmul.bf16.vlgmr.msra.gmra.mxu2 %v873_v17 }
 0x11a   : > { %1120 = vmatmul.bf16.vlgmr.msra.gmra.mxu3 %v874_v19 }
 0x11c   : > { %1262 = vmatpush.bf16.msrb.mxu0 %v1944_v20 }
 0x11d   : > { %1275 = vmatpush.bf16.msrb.mxu1 %v1952_v21 }
 0x120   : > { %1263 = vmatpush.bf16.msrb.mxu0 %v1943_v22 }
 0x121   : > { %1276 = vmatpush.bf16.msrb.mxu1 %v1951_v23 }
 0x124   : > { %1264 = vmatpush.bf16.msrb.mxu0 %v1942_v24 }
 0x125   : > { %1277 = vmatpush.bf16.msrb.mxu1 %v1950_v59 }
 0x128   : > { %1265 = vmatpush.bf16.msrb.mxu0 %v1941_v25 }
 0x129   : > { %1278 = vmatpush.bf16.msrb.mxu1 %v1949_v26 }
 0x12c   : > { %1266 = vmatpush.bf16.msrb.mxu0 %v1940_v61 }
 0x12d   : > { %1279 = vmatpush.bf16.msrb.mxu1 %v1948_v27 }
 0x130   : > { %1267 = vmatpush.bf16.msrb.mxu0 %v1939_v55 }
 0x131   : > { %1280 = vmatpush.bf16.msrb.mxu1 %v1947_v28 }
 0x134   : > { %1268 = vmatpush.bf16.msrb.mxu0 %v1938_v58 }
 0x135   : > { %1281 = vmatpush.bf16.msrb.mxu1 %v1946_v29 }
 0x194   : > { %v1082_v32 = vpop.f32.mrf.mxu0 }
 0x195   : > { %v1083_v33 = vadd.f32 %v1082_v32, %v909_v31  ;;  %v1095_v34 = vpop.f32.mrf.mxu1 }
 0x197   : > { %v1096_v35 = vadd.f32 %v1095_v34, %v1083_v33 }
 0x199   : > { %v1125_v37 = vmax.f32 %v1096_v35, 0.0 }
 0x19b   : > { %v1127_v38 = vpack.c.bf16 %v1125_v37, %v1125_v37 }
 0x19c   : > { %v1108_v39 = vpop.f32.mrf.mxu2  ;;  %v1084_v42 = vpop.f32.mrf.mxu0 }
 0x19d   : > { %v1109_v40 = vadd.f32 %v1108_v39, %v910_v36  ;;  %v1121_v41 = vpop.f32.mrf.mxu3  ;;  %v1097_v43 = vpop.f32.mrf.mxu1  ;;  %1269 = vmatmul.bf16.vlgmr.msrb.gmra.mxu0 %v1127_v38 }
 0x19f   : > { %v1122_v44 = vadd.f32 %v1121_v41, %v1109_v40 }
 0x1a1   : > { %v1126_v45 = vmax.f32 %v1122_v44, 0.0 }
 0x1a3   : > { %v1128_v46 = vpack.c.bf16 %v1126_v45, %v1126_v45 }
 0x1a4   : > { %v1110_v47 = vpop.f32.mrf.mxu2 }
 0x1a5   : > { %v1123_v48 = vpop.f32.mrf.mxu3  ;;  %1282 = vmatmul.bf16.vlgmr.msrb.gmra.mxu1 %v1128_v46 }
 0x21a   : > { %v1270_v50 = vpop.f32.mrf.mxu0 }
 0x21b   : > { %v1271_v51 = vadd.f32 %v2012_v49, %v1270_v50 }
 0x222   : > { %v1283_v52 = vpop.f32.mrf.mxu1  ;;  %v1272_v54 = vpop.f32.mrf.mxu0 }
 0x223   : > { %v1284_v53 = vadd.f32 %v1283_v52, %v1271_v51 }
 0x225   : > { %1287 = vst [vmem:[%s2638_s7] sm:$0xff] %v1284_v53 }
 0x22a   : > { %v1285_v56 = vpop.f32.mrf.mxu1 }
 0x22b PF: > { %s20_s29 = sadd.s32 1, %s2093_s29   ;;  %s2641_s24 = smov %s2077_s25 }
 0x22c   : > { %p17_p2 = scmp.ge.s32.totalorder %s20_s29, 4   ;;  %s2642_s25 = smov %s2081_s26 }
 0x22d   : > { %s2643_s26 = smov %s2187_s13  ;;  %s2644_s27 = smov %s2089_s28 }
 0x22e   : > { %s2645_s28 = smov %s2647_s8  ;;  %19 = sbr.rel (!%p17_p2) target bundleno = 4 (0x4), region = 99 }
 0x233   :  { %1307 = vsyncpa [#allocation4], 1 }
 0x234   :  { %1309 = vsyncpa [#allocation4 + $0x1], 1 }

</bundles_post_ra>
